<compile_context>
chip_gen: v7x
topology: tpu7x:2x2x1
jax: 0.10.0
libtpu: 0.0.40
codegen_flags: <defaults>
</compile_context>

<pallas_src>
import functools

import jax
import jax.numpy as jnp
from jax.experimental import pallas as pl
from jax.experimental.pallas import tpu as pltpu


# --------------------------------------------------------------------------
# Pallas kernel 1: brownian_proj (Linear) + F.normalize(dim=-1)
# --------------------------------------------------------------------------
def _proj_norm_kernel(x_ref, w_ref, b_ref, o_ref):
    # y = x @ W.T + b   (W.T passed in pre-transposed as (hidden, proj))
    y = jnp.dot(x_ref[...], w_ref[...], preferred_element_type=jnp.float32)
    y = y + b_ref[...]
    # F.normalize(dim=-1): x / max(||x||, 1e-12) == x * rsqrt(max(||x||^2, 1e-24))
    ssq = jnp.sum(y * y, axis=-1, keepdims=True)
    o_ref[...] = y * jax.lax.rsqrt(jnp.maximum(ssq, 1e-24))


def _pick_tile_m(m):
    # Largest nice row tile that divides M.  (Production: pad M to a multiple
    # of 512 so blocks stay big; at the test shape this is a single step.)
    for tm in (512, 256, 128, 64, 32, 16, 8):
        if m % tm == 0:
            return tm
    return m


def proj_and_normalize(x2d, w_t, b):
    m, c = x2d.shape
    p = w_t.shape[1]
    tile_m = _pick_tile_m(m)
    return pl.pallas_call(
        _proj_norm_kernel,
        grid=(m // tile_m,),
        in_specs=[
            pl.BlockSpec((tile_m, c), lambda i: (i, 0)),   # activations, tiled
            pl.BlockSpec((c, p), lambda i: (0, 0)),        # weight, resident
            pl.BlockSpec((1, p), lambda i: (0, 0)),        # bias, resident
        ],
        out_specs=pl.BlockSpec((tile_m, p), lambda i: (i, 0)),
        out_shape=jax.ShapeDtypeStruct((m, p), jnp.float32),
        compiler_params=pltpu.CompilerParams(
            dimension_semantics=("parallel",)),
    )(x2d, w_t, b.reshape(1, p))


# --------------------------------------------------------------------------
# Pallas kernel 2: brownian-bridge pairwise distances (the hot path)
#   dist[i, j] = -|| neg[bp_i, j, :] - ((1-a_i)*head_i + a_i*tail_i) ||^2
#                / (2 * sigma_i^2)
# with bridge (0, bp_i, t-1)  =>  a_i = bp_i/(t-1), sigma_i = a_i*(t-1-bp_i).
#
# Batched over a block of bridge rows per grid step.  The negatives (T, N, C)
# are a resident full VMEM block; the bp_i time slice is selected in-kernel.
# --------------------------------------------------------------------------
def _bridge_dist_kernel(bp_ref, head_ref, tail_ref, neg_ref, dist_ref):
    t, n, _ = neg_ref.shape
    bp_block = head_ref.shape[0]
    n_pad = dist_ref.shape[1]

    bp_i = bp_ref[...]                                   # (BP, 1) int32
    bp_f = bp_i.astype(jnp.float32)
    alpha = bp_f * (1.0 / (t - 1.0))
    sigma = alpha * ((t - 1.0) - bp_f)
    inv_2s2 = pl.reciprocal(2.0 * sigma * sigma, approx=True)   # EUP slot, ~free

    head = head_ref[...]                                 # (BP, C)
    tail = tail_ref[...]                                 # (BP, C)
    center = (1.0 - alpha) * head + alpha * tail         # (BP, C)
    center_sq = jnp.sum(center * center, axis=-1, keepdims=True)   # (BP, 1)

    # Augmented LHS so a single MXU matmul yields  -2*center.neg + ||neg||^2.
    cen_aug = jnp.concatenate(
        [-2.0 * center, jnp.ones((bp_block, 1), jnp.float32)], axis=-1)  # (BP, C+1)

    # Bridge mid-point lies in [1, t-2]; static unrolled time loop, masked merge.
    sq = jnp.zeros((bp_block, n), dtype=jnp.float32)
    for tt in range(1, t - 1):
        neg_tt = neg_ref[tt]                             # (N, C), resident slice
        neg_aug = jnp.concatenate(
            [neg_tt, jnp.sum(neg_tt * neg_tt, axis=-1, keepdims=True)],
            axis=-1)                                     # (N, C+1)
        cross = jax.lax.dot_general(                     # (BP, N) on the MXU
            cen_aug, neg_aug, (((1,), (1,)), ((), ())),
            preferred_element_type=jnp.float32)
        sq = jnp.where(bp_i == tt, center_sq + cross, sq)

    dist = -sq * inv_2s2                                 # (BP, N)
    if n_pad > n:                                        # lane-dense (., 128) store
        dist = jnp.concatenate(
            [dist, jnp.full((bp_block, n_pad - n), -3.0e4, jnp.float32)],
            axis=-1)
    dist_ref[...] = dist


def bridge_distances(bp, neg_t):
    t, n, c = neg_t.shape
    p = n                                    # world_size == 1: negatives == positives
    bp_block = 8 if (p % 8 == 0 and p > 8) else p
    n_pad = max(128, ((n + 127) // 128) * 128)
    bp2d = bp.reshape(p, 1)

    dist_padded = pl.pallas_call(
        _bridge_dist_kernel,
        grid=(p // bp_block,),
        in_specs=[
            pl.BlockSpec((bp_block, 1), lambda i: (i, 0)),              # bp
            pl.BlockSpec((None, bp_block, c), lambda i: (0, i, 0)),     # heads (t=0)
            pl.BlockSpec((None, bp_block, c), lambda i: (t - 1, i, 0)), # tails (t=T-1)
            pl.BlockSpec((t, n, c), lambda i: (0, 0, 0)),               # negatives, resident
        ],
        out_specs=pl.BlockSpec((bp_block, n_pad), lambda i: (i, 0)),
        out_shape=jax.ShapeDtypeStruct((p, n_pad), jnp.float32),
        compiler_params=pltpu.CompilerParams(
            dimension_semantics=("parallel",)),
    )(bp2d, neg_t, neg_t, neg_t)
    return dist_padded[:, :n]


# --------------------------------------------------------------------------
# Forward pass of BrownianBridgeCriterion
# --------------------------------------------------------------------------
def brownian_bridge_criterion(frame_embeds, w, b, bridge_key, delta=0.3):
    bs, t, q, c = frame_embeds.shape
    proj_dim = w.shape[0]

    # 1) linear projection (Pallas matmul) + per-vector L2 normalize
    x2d = frame_embeds.reshape(bs * t * q, c)
    y2d = proj_and_normalize(x2d, jnp.transpose(w), b)
    y = y2d.reshape(bs, t, q, proj_dim)

    # concat_all_gather / get_rank: single-process simulation (world_size=1,
    # rank=0) => other_embeds is empty; negatives == cur_embeds.
    # TODO(synk): true cross-device all-gather (concat_all_gather) would need a
    # collective / pltpu.make_async_remote_copy ring; not modeled here.
    n = bs * q
    # Time-major (T, N, C) normalized embeddings (the module's permute(0,2,1,3)
    # folded into a single small XLA transpose; head/tail come straight out of
    # this tensor via BlockSpecs, no separate slices).
    neg_t = jnp.transpose(y, (1, 0, 2, 3)).reshape(t, n, proj_dim)

    # bridge = [0, randint(1, t-1), t-1]  (requires t >= 3; deterministic JAX RNG)
    bp = jax.random.randint(bridge_key, (n,), 1, t - 1, dtype=jnp.int32)

    dist = bridge_distances(bp, neg_t)                   # (n, n)

    # numerator == exp(diag(dist)) since the positives sit first in the negatives
    idx = jnp.arange(n)
    diag = dist[idx, idx]
    numer = jnp.exp(diag)

    # denominator: mask self with -10000, top-5 (needs n >= 6), re-prepend, exp, sum
    dist_masked = dist.at[idx, idx].set(-10000.0)
    top5, _ = jax.lax.top_k(dist_masked, 5)
    deno = jnp.exp(jnp.concatenate([diag[:, None], top5], axis=-1))      # (n, 6)
    brownian_loss = jnp.mean(numer / jnp.sum(deno, axis=-1))

    # head/tail match: softplus(delta - <cur[:,0], cur[:,-1]>).mean()  (plain XLA)
    score = jnp.einsum("nc,nc->n", neg_t[0], neg_t[t - 1])
    head_tail_match = jnp.mean(jax.nn.softplus(delta - score))
    return brownian_loss, head_tail_match


if __name__ == "__main__":
    bs, t, q = 2, 8, 8
    hidden_dim, proj_dim = 32, 32

    key = jax.random.PRNGKey(0)
    k_x, k_w, k_b, k_bridge = jax.random.split(key, 4)

    frame_embeds = jax.random.normal(k_x, (bs, t, q, hidden_dim), dtype=jnp.float32)

    # deterministic nn.Linear-style init (uniform(-1/sqrt(fan_in), 1/sqrt(fan_in)))
    bound = 1.0 / (hidden_dim ** 0.5)
    w = jax.random.uniform(k_w, (proj_dim, hidden_dim),
                           minval=-bound, maxval=bound, dtype=jnp.float32)
    b = jax.random.uniform(k_b, (proj_dim,),
                           minval=-bound, maxval=bound, dtype=jnp.float32)

    loss_fn = jax.jit(functools.partial(brownian_bridge_criterion, delta=0.3))
    brownian_loss, head_tail_match = loss_fn(frame_embeds, w, b, k_bridge)
    jax.block_until_ready((brownian_loss, head_tail_match))
    assert jnp.isfinite(brownian_loss) and jnp.isfinite(head_tail_match)
    print("KERNEL_OK")
</pallas_src>

<mosaic_0001>
module attributes {stable_mosaic.version = 11 : i64} {
  func.func @_bridge_dist_kernel(%arg0: i32, %arg1: memref<8x1xi32, #tpu.memory_space<vmem>>, %arg2: memref<1x8x32xf32, #tpu.memory_space<vmem>>, %arg3: memref<1x8x32xf32, #tpu.memory_space<vmem>>, %arg4: memref<8x16x32xf32, #tpu.memory_space<vmem>>, %arg5: memref<8x128xf32, #tpu.memory_space<vmem>>) attributes {dimension_semantics = [#tpu.dimension_semantics<parallel>], iteration_bounds = array<i64: 2>, scalar_prefetch = 0 : i64, scratch_operands = 0 : i64, tpu.core_type = #tpu.core_type<tc>, window_params = [{transform_indices = @transform_0, window_bounds = array<i64: 8, 1>}, {transform_indices = @transform_1, window_bounds = array<i64: 1, 8, 32>}, {transform_indices = @transform_2, window_bounds = array<i64: 1, 8, 32>}, {pipeline_mode = #tpu.pipeline_mode<synchronous>, transform_indices = @transform_3, window_bounds = array<i64: 8, 16, 32>}, {transform_indices = @transform_4, window_bounds = array<i64: 8, 128>}]} {
    %c0 = arith.constant 0 : index
    %c0_0 = arith.constant 0 : index
    %0 = vector.load %arg1[%c0, %c0_0] : memref<8x1xi32, #tpu.memory_space<vmem>>, vector<8x1xi32>
    %1 = arith.sitofp %0 : vector<8x1xi32> to vector<8x1xf32>
    %cst = arith.constant 0.142857149 : f32
    %2 = vector.broadcast %cst : f32 to vector<8x1xf32>
    %3 = arith.mulf %1, %2 : vector<8x1xf32>
    %cst_1 = arith.constant 7.000000e+00 : f32
    %4 = vector.broadcast %cst_1 : f32 to vector<8x1xf32>
    %5 = arith.subf %4, %1 : vector<8x1xf32>
    %6 = arith.mulf %3, %5 : vector<8x1xf32>
    %cst_2 = arith.constant 2.000000e+00 : f32
    %7 = vector.broadcast %cst_2 : f32 to vector<8x1xf32>
    %8 = arith.mulf %7, %6 : vector<8x1xf32>
    %9 = arith.mulf %8, %6 : vector<8x1xf32>
    %10 = tpu.reciprocal %9 {approx = true} : vector<8x1xf32> -> vector<8x1xf32>
    %c0_3 = arith.constant 0 : index
    %c0_4 = arith.constant 0 : index
    %c0_5 = arith.constant 0 : index
    %11 = vector.load %arg2[%c0_3, %c0_4, %c0_5] : memref<1x8x32xf32, #tpu.memory_space<vmem>>, vector<1x8x32xf32>
    %12 = vector.shape_cast %11 : vector<1x8x32xf32> to vector<8x32xf32>
    %c0_6 = arith.constant 0 : index
    %c0_7 = arith.constant 0 : index
    %c0_8 = arith.constant 0 : index
    %13 = vector.load %arg3[%c0_6, %c0_7, %c0_8] : memref<1x8x32xf32, #tpu.memory_space<vmem>>, vector<1x8x32xf32>
    %14 = vector.shape_cast %13 : vector<1x8x32xf32> to vector<8x32xf32>
    %cst_9 = arith.constant 1.000000e+00 : f32
    %15 = vector.broadcast %cst_9 : f32 to vector<8x1xf32>
    %16 = arith.subf %15, %3 : vector<8x1xf32>
    %17 = vector.broadcast %16 : vector<8x1xf32> to vector<8x32xf32>
    %18 = arith.mulf %17, %12 : vector<8x32xf32>
    %19 = vector.broadcast %3 : vector<8x1xf32> to vector<8x32xf32>
    %20 = arith.mulf %19, %14 : vector<8x32xf32>
    %21 = arith.addf %18, %20 : vector<8x32xf32>
    %22 = arith.mulf %21, %21 : vector<8x32xf32>
    %cst_10 = arith.constant dense<0.000000e+00> : vector<8xf32>
    %23 = vector.multi_reduction <add>, %22, %cst_10 [1] : vector<8x32xf32> to vector<8xf32>
    %24 = vector.shape_cast %23 : vector<8xf32> to vector<8x1xf32>
    %cst_11 = arith.constant -2.000000e+00 : f32
    %25 = vector.broadcast %cst_11 : f32 to vector<8x32xf32>
    %26 = arith.mulf %25, %21 : vector<8x32xf32>
    %cst_12 = arith.constant 1.000000e+00 : f32
    %27 = vector.broadcast %cst_12 : f32 to vector<8x1xf32>
    %28 = tpu.concatenate %26, %27 in 1 : vector<8x32xf32>, vector<8x1xf32> -> vector<8x33xf32>
    %cst_13 = arith.constant 0.000000e+00 : f32
    %29 = vector.broadcast %cst_13 : f32 to vector<8x16xf32>
    %c1 = arith.constant 1 : index
    %c0_14 = arith.constant 0 : index
    %c0_15 = arith.constant 0 : index
    %30 = vector.load %arg4[%c1, %c0_14, %c0_15] : memref<8x16x32xf32, #tpu.memory_space<vmem>>, vector<1x16x32xf32>
    %31 = vector.shape_cast %30 : vector<1x16x32xf32> to vector<16x32xf32>
    %32 = arith.mulf %31, %31 : vector<16x32xf32>
    %cst_16 = arith.constant dense<0.000000e+00> : vector<16xf32>
    %33 = vector.multi_reduction <add>, %32, %cst_16 [1] : vector<16x32xf32> to vector<16xf32>
    %34 = vector.shape_cast %33 : vector<16xf32> to vector<16x1xf32>
    %35 = tpu.concatenate %31, %34 in 1 : vector<16x32xf32>, vector<16x1xf32> -> vector<16x33xf32>
    %cst_17 = arith.constant dense<0.000000e+00> : vector<8x16xf32>
    %36 = tpu.matmul %28, %35, %cst_17 {dimension_numbers = #tpu.dot_dimension_numbers<[1], [1], [0], [0], [0, 0, 1, 0], [], []>} : vector<8x33xf32>, vector<16x33xf32>, vector<8x16xf32> -> vector<8x16xf32>
    %c1_i32 = arith.constant 1 : i32
    %37 = vector.broadcast %c1_i32 : i32 to vector<8x1xi32>
    %38 = arith.cmpi eq, %0, %37 : vector<8x1xi32>
    %39 = vector.broadcast %24 : vector<8x1xf32> to vector<8x16xf32>
    %40 = arith.addf %39, %36 : vector<8x16xf32>
    %41 = vector.shape_cast %38 : vector<8x1xi1> to vector<8x1xi1>
    %42 = vector.broadcast %41 : vector<8x1xi1> to vector<8x16xi1>
    %43 = arith.select %42, %40, %29 : vector<8x16xi1>, vector<8x16xf32>
    %c2 = arith.constant 2 : index
    %c0_18 = arith.constant 0 : index
    %c0_19 = arith.constant 0 : index
    %44 = vector.load %arg4[%c2, %c0_18, %c0_19] : memref<8x16x32xf32, #tpu.memory_space<vmem>>, vector<1x16x32xf32>
    %45 = vector.shape_cast %44 : vector<1x16x32xf32> to vector<16x32xf32>
    %46 = arith.mulf %45, %45 : vector<16x32xf32>
    %cst_20 = arith.constant dense<0.000000e+00> : vector<16xf32>
    %47 = vector.multi_reduction <add>, %46, %cst_20 [1] : vector<16x32xf32> to vector<16xf32>
    %48 = vector.shape_cast %47 : vector<16xf32> to vector<16x1xf32>
    %49 = tpu.concatenate %45, %48 in 1 : vector<16x32xf32>, vector<16x1xf32> -> vector<16x33xf32>
    %cst_21 = arith.constant dense<0.000000e+00> : vector<8x16xf32>
    %50 = tpu.matmul %28, %49, %cst_21 {dimension_numbers = #tpu.dot_dimension_numbers<[1], [1], [0], [0], [0, 0, 1, 0], [], []>} : vector<8x33xf32>, vector<16x33xf32>, vector<8x16xf32> -> vector<8x16xf32>
    %c2_i32 = arith.constant 2 : i32
    %51 = vector.broadcast %c2_i32 : i32 to vector<8x1xi32>
    %52 = arith.cmpi eq, %0, %51 : vector<8x1xi32>
    %53 = vector.broadcast %24 : vector<8x1xf32> to vector<8x16xf32>
    %54 = arith.addf %53, %50 : vector<8x16xf32>
    %55 = vector.shape_cast %52 : vector<8x1xi1> to vector<8x1xi1>
    %56 = vector.broadcast %55 : vector<8x1xi1> to vector<8x16xi1>
    %57 = arith.select %56, %54, %43 : vector<8x16xi1>, vector<8x16xf32>
    %c3 = arith.constant 3 : index
    %c0_22 = arith.constant 0 : index
    %c0_23 = arith.constant 0 : index
    %58 = vector.load %arg4[%c3, %c0_22, %c0_23] : memref<8x16x32xf32, #tpu.memory_space<vmem>>, vector<1x16x32xf32>
    %59 = vector.shape_cast %58 : vector<1x16x32xf32> to vector<16x32xf32>
    %60 = arith.mulf %59, %59 : vector<16x32xf32>
    %cst_24 = arith.constant dense<0.000000e+00> : vector<16xf32>
    %61 = vector.multi_reduction <add>, %60, %cst_24 [1] : vector<16x32xf32> to vector<16xf32>
    %62 = vector.shape_cast %61 : vector<16xf32> to vector<16x1xf32>
    %63 = tpu.concatenate %59, %62 in 1 : vector<16x32xf32>, vector<16x1xf32> -> vector<16x33xf32>
    %cst_25 = arith.constant dense<0.000000e+00> : vector<8x16xf32>
    %64 = tpu.matmul %28, %63, %cst_25 {dimension_numbers = #tpu.dot_dimension_numbers<[1], [1], [0], [0], [0, 0, 1, 0], [], []>} : vector<8x33xf32>, vector<16x33xf32>, vector<8x16xf32> -> vector<8x16xf32>
    %c3_i32 = arith.constant 3 : i32
    %65 = vector.broadcast %c3_i32 : i32 to vector<8x1xi32>
    %66 = arith.cmpi eq, %0, %65 : vector<8x1xi32>
    %67 = vector.broadcast %24 : vector<8x1xf32> to vector<8x16xf32>
    %68 = arith.addf %67, %64 : vector<8x16xf32>
    %69 = vector.shape_cast %66 : vector<8x1xi1> to vector<8x1xi1>
    %70 = vector.broadcast %69 : vector<8x1xi1> to vector<8x16xi1>
    %71 = arith.select %70, %68, %57 : vector<8x16xi1>, vector<8x16xf32>
    %c4 = arith.constant 4 : index
    %c0_26 = arith.constant 0 : index
    %c0_27 = arith.constant 0 : index
    %72 = vector.load %arg4[%c4, %c0_26, %c0_27] : memref<8x16x32xf32, #tpu.memory_space<vmem>>, vector<1x16x32xf32>
    %73 = vector.shape_cast %72 : vector<1x16x32xf32> to vector<16x32xf32>
    %74 = arith.mulf %73, %73 : vector<16x32xf32>
    %cst_28 = arith.constant dense<0.000000e+00> : vector<16xf32>
    %75 = vector.multi_reduction <add>, %74, %cst_28 [1] : vector<16x32xf32> to vector<16xf32>
    %76 = vector.shape_cast %75 : vector<16xf32> to vector<16x1xf32>
    %77 = tpu.concatenate %73, %76 in 1 : vector<16x32xf32>, vector<16x1xf32> -> vector<16x33xf32>
    %cst_29 = arith.constant dense<0.000000e+00> : vector<8x16xf32>
    %78 = tpu.matmul %28, %77, %cst_29 {dimension_numbers = #tpu.dot_dimension_numbers<[1], [1], [0], [0], [0, 0, 1, 0], [], []>} : vector<8x33xf32>, vector<16x33xf32>, vector<8x16xf32> -> vector<8x16xf32>
    %c4_i32 = arith.constant 4 : i32
    %79 = vector.broadcast %c4_i32 : i32 to vector<8x1xi32>
    %80 = arith.cmpi eq, %0, %79 : vector<8x1xi32>
    %81 = vector.broadcast %24 : vector<8x1xf32> to vector<8x16xf32>
    %82 = arith.addf %81, %78 : vector<8x16xf32>
    %83 = vector.shape_cast %80 : vector<8x1xi1> to vector<8x1xi1>
    %84 = vector.broadcast %83 : vector<8x1xi1> to vector<8x16xi1>
    %85 = arith.select %84, %82, %71 : vector<8x16xi1>, vector<8x16xf32>
    %c5 = arith.constant 5 : index
    %c0_30 = arith.constant 0 : index
    %c0_31 = arith.constant 0 : index
    %86 = vector.load %arg4[%c5, %c0_30, %c0_31] : memref<8x16x32xf32, #tpu.memory_space<vmem>>, vector<1x16x32xf32>
    %87 = vector.shape_cast %86 : vector<1x16x32xf32> to vector<16x32xf32>
    %88 = arith.mulf %87, %87 : vector<16x32xf32>
    %cst_32 = arith.constant dense<0.000000e+00> : vector<16xf32>
    %89 = vector.multi_reduction <add>, %88, %cst_32 [1] : vector<16x32xf32> to vector<16xf32>
    %90 = vector.shape_cast %89 : vector<16xf32> to vector<16x1xf32>
    %91 = tpu.concatenate %87, %90 in 1 : vector<16x32xf32>, vector<16x1xf32> -> vector<16x33xf32>
    %cst_33 = arith.constant dense<0.000000e+00> : vector<8x16xf32>
    %92 = tpu.matmul %28, %91, %cst_33 {dimension_numbers = #tpu.dot_dimension_numbers<[1], [1], [0], [0], [0, 0, 1, 0], [], []>} : vector<8x33xf32>, vector<16x33xf32>, vector<8x16xf32> -> vector<8x16xf32>
    %c5_i32 = arith.constant 5 : i32
    %93 = vector.broadcast %c5_i32 : i32 to vector<8x1xi32>
    %94 = arith.cmpi eq, %0, %93 : vector<8x1xi32>
    %95 = vector.broadcast %24 : vector<8x1xf32> to vector<8x16xf32>
    %96 = arith.addf %95, %92 : vector<8x16xf32>
    %97 = vector.shape_cast %94 : vector<8x1xi1> to vector<8x1xi1>
    %98 = vector.broadcast %97 : vector<8x1xi1> to vector<8x16xi1>
    %99 = arith.select %98, %96, %85 : vector<8x16xi1>, vector<8x16xf32>
    %c6 = arith.constant 6 : index
    %c0_34 = arith.constant 0 : index
    %c0_35 = arith.constant 0 : index
    %100 = vector.load %arg4[%c6, %c0_34, %c0_35] : memref<8x16x32xf32, #tpu.memory_space<vmem>>, vector<1x16x32xf32>
    %101 = vector.shape_cast %100 : vector<1x16x32xf32> to vector<16x32xf32>
    %102 = arith.mulf %101, %101 : vector<16x32xf32>
    %cst_36 = arith.constant dense<0.000000e+00> : vector<16xf32>
    %103 = vector.multi_reduction <add>, %102, %cst_36 [1] : vector<16x32xf32> to vector<16xf32>
    %104 = vector.shape_cast %103 : vector<16xf32> to vector<16x1xf32>
    %105 = tpu.concatenate %101, %104 in 1 : vector<16x32xf32>, vector<16x1xf32> -> vector<16x33xf32>
    %cst_37 = arith.constant dense<0.000000e+00> : vector<8x16xf32>
    %106 = tpu.matmul %28, %105, %cst_37 {dimension_numbers = #tpu.dot_dimension_numbers<[1], [1], [0], [0], [0, 0, 1, 0], [], []>} : vector<8x33xf32>, vector<16x33xf32>, vector<8x16xf32> -> vector<8x16xf32>
    %c6_i32 = arith.constant 6 : i32
    %107 = vector.broadcast %c6_i32 : i32 to vector<8x1xi32>
    %108 = arith.cmpi eq, %0, %107 : vector<8x1xi32>
    %109 = vector.broadcast %24 : vector<8x1xf32> to vector<8x16xf32>
    %110 = arith.addf %109, %106 : vector<8x16xf32>
    %111 = vector.shape_cast %108 : vector<8x1xi1> to vector<8x1xi1>
    %112 = vector.broadcast %111 : vector<8x1xi1> to vector<8x16xi1>
    %113 = arith.select %112, %110, %99 : vector<8x16xi1>, vector<8x16xf32>
    %cst_38 = arith.constant 0.000000e+00 : f32
    %114 = vector.broadcast %cst_38 : f32 to vector<8x16xf32>
    %115 = arith.subf %114, %113 : vector<8x16xf32>
    %116 = vector.broadcast %10 : vector<8x1xf32> to vector<8x16xf32>
    %117 = arith.mulf %115, %116 : vector<8x16xf32>
    %cst_39 = arith.constant -3.000000e+04 : f32
    %118 = vector.broadcast %cst_39 : f32 to vector<8x112xf32>
    %119 = tpu.concatenate %117, %118 in 1 : vector<8x16xf32>, vector<8x112xf32> -> vector<8x128xf32>
    %c0_40 = arith.constant 0 : index
    %c0_41 = arith.constant 0 : index
    %120 = vector.load %arg5[%c0_40, %c0_41] : memref<8x128xf32, #tpu.memory_space<vmem>>, vector<8x128xf32>
    tpu.vector_store %arg5[%c0_40, %c0_41], %119 {strides = array<i32>} : memref<8x128xf32, #tpu.memory_space<vmem>>, vector<8x128xf32>,
    return
  }
  func.func @transform_0(%arg0: i32) -> (i32, i32) {
    %c0_i32 = arith.constant 0 : i32
    %c0_i32_0 = arith.constant 0 : i32
    return %arg0, %c0_i32 : i32, i32
  }
  func.func @transform_1(%arg0: i32) -> (i32, i32, i32) {
    %c0_i32 = arith.constant 0 : i32
    %c0_i32_0 = arith.constant 0 : i32
    %c0_i32_1 = arith.constant 0 : i32
    return %c0_i32, %arg0, %c0_i32_0 : i32, i32, i32
  }
  func.func @transform_2(%arg0: i32) -> (i32, i32, i32) {
    %c7_i32 = arith.constant 7 : i32
    %c0_i32 = arith.constant 0 : i32
    %c0_i32_0 = arith.constant 0 : i32
    return %c7_i32, %arg0, %c0_i32 : i32, i32, i32
  }
  func.func @transform_3(%arg0: i32) -> (i32, i32, i32) {
    %c0_i32 = arith.constant 0 : i32
    %c0_i32_0 = arith.constant 0 : i32
    %c0_i32_1 = arith.constant 0 : i32
    %c0_i32_2 = arith.constant 0 : i32
    return %c0_i32, %c0_i32_0, %c0_i32_1 : i32, i32, i32
  }
  func.func @transform_4(%arg0: i32) -> (i32, i32) {
    %c0_i32 = arith.constant 0 : i32
    %c0_i32_0 = arith.constant 0 : i32
    return %arg0, %c0_i32 : i32, i32
  }
}

module attributes {stable_mosaic.version = 11 : i64} {
  func.func @_proj_norm_kernel(%arg0: i32, %arg1: memref<128x32xf32, #tpu.memory_space<vmem>>, %arg2: memref<32x32xf32, #tpu.memory_space<vmem>>, %arg3: memref<1x32xf32, #tpu.memory_space<vmem>>, %arg4: memref<128x32xf32, #tpu.memory_space<vmem>>) attributes {dimension_semantics = [#tpu.dimension_semantics<parallel>], iteration_bounds = array<i64: 1>, scalar_prefetch = 0 : i64, scratch_operands = 0 : i64, tpu.core_type = #tpu.core_type<tc>, window_params = [{transform_indices = @transform_0, window_bounds = array<i64: 128, 32>}, {pipeline_mode = #tpu.pipeline_mode<synchronous>, transform_indices = @transform_1, window_bounds = array<i64: 32, 32>}, {pipeline_mode = #tpu.pipeline_mode<synchronous>, transform_indices = @transform_2, window_bounds = array<i64: 1, 32>}, {transform_indices = @transform_3, window_bounds = array<i64: 128, 32>}]} {
    %c0 = arith.constant 0 : index
    %c0_0 = arith.constant 0 : index
    %0 = vector.load %arg1[%c0, %c0_0] : memref<128x32xf32, #tpu.memory_space<vmem>>, vector<128x32xf32>
    %c0_1 = arith.constant 0 : index
    %c0_2 = arith.constant 0 : index
    %1 = vector.load %arg2[%c0_1, %c0_2] : memref<32x32xf32, #tpu.memory_space<vmem>>, vector<32x32xf32>
    %cst = arith.constant dense<0.000000e+00> : vector<128x32xf32>
    %2 = tpu.matmul %0, %1, %cst {dimension_numbers = #tpu.dot_dimension_numbers<[1], [0], [0], [1], [0, 0, 1, 1], [], []>} : vector<128x32xf32>, vector<32x32xf32>, vector<128x32xf32> -> vector<128x32xf32>
    %c0_3 = arith.constant 0 : index
    %c0_4 = arith.constant 0 : index
    %3 = vector.load %arg3[%c0_3, %c0_4] : memref<1x32xf32, #tpu.memory_space<vmem>>, vector<1x32xf32>
    %4 = vector.broadcast %3 : vector<1x32xf32> to vector<128x32xf32>
    %5 = arith.addf %2, %4 : vector<128x32xf32>
    %6 = arith.mulf %5, %5 : vector<128x32xf32>
    %cst_5 = arith.constant dense<0.000000e+00> : vector<128xf32>
    %7 = vector.multi_reduction <add>, %6, %cst_5 [1] : vector<128x32xf32> to vector<128xf32>
    %8 = vector.shape_cast %7 : vector<128xf32> to vector<128x1xf32>
    %cst_6 = arith.constant 1.000000e-24 : f32
    %9 = vector.broadcast %cst_6 : f32 to vector<128x1xf32>
    %10 = arith.maximumf %8, %9 : vector<128x1xf32>
    %11 = math.rsqrt %10 : vector<128x1xf32>
    %12 = vector.broadcast %11 : vector<128x1xf32> to vector<128x32xf32>
    %13 = arith.mulf %5, %12 : vector<128x32xf32>
    %c0_7 = arith.constant 0 : index
    %c0_8 = arith.constant 0 : index
    %14 = vector.load %arg4[%c0_7, %c0_8] : memref<128x32xf32, #tpu.memory_space<vmem>>, vector<128x32xf32>
    tpu.vector_store %arg4[%c0_7, %c0_8], %13 {strides = array<i32>} : memref<128x32xf32, #tpu.memory_space<vmem>>, vector<128x32xf32>,
    return
  }
  func.func @transform_0(%arg0: i32) -> (i32, i32) {
    %c0_i32 = arith.constant 0 : i32
    %c0_i32_0 = arith.constant 0 : i32
    return %arg0, %c0_i32 : i32, i32
  }
  func.func @transform_1(%arg0: i32) -> (i32, i32) {
    %c0_i32 = arith.constant 0 : i32
    %c0_i32_0 = arith.constant 0 : i32
    %c0_i32_1 = arith.constant 0 : i32
    return %c0_i32, %c0_i32_0 : i32, i32
  }
  func.func @transform_2(%arg0: i32) -> (i32, i32) {
    %c0_i32 = arith.constant 0 : i32
    %c0_i32_0 = arith.constant 0 : i32
    %c0_i32_1 = arith.constant 0 : i32
    return %c0_i32, %c0_i32_0 : i32, i32
  }
  func.func @transform_3(%arg0: i32) -> (i32, i32) {
    %c0_i32 = arith.constant 0 : i32
    %c0_i32_0 = arith.constant 0 : i32
    return %arg0, %c0_i32 : i32, i32
  }
}

</mosaic_0001>

<bundles_post_ra>
// kernel: brownian_bridge_criterion.2
= control target key start
LH: loop header
LB: loop body
LE: loop exit
PB: predicated region body
PF: predicated region fallthrough
CT: control target
= control target key end

     0   :  { %vm41_vm0 = vcmask 261120   ;;  %s757_s1 = inlined_call_operand.vmem [shape: f32[32,32], index: 1, kind: input, shape index: {}]   ;;  %s758_s0 = inlined_call_operand.vmem [shape: f32[128,32], index: 0, kind: input, shape index: {}]   ;;  %s759_s2 = inlined_call_operand.vmem [shape: f32[1,32], index: 2, kind: input, shape index: {}]   ;;  %s760_s3 = inlined_call_operand.vmem [shape: f32[128,32], index: 3, kind: output, shape index: {}]  }
   0x1   :  { %v30_v0 = vld [vmem:[%s757_s1] sm:$0xff]  ;;  %v31_v1 = vld [vmem:[%s757_s1 + $0x8] sm:$0xff]  ;;  %v32_v2 = vld [vmem:[%s757_s1 + $0x10] sm:$0xff] }
   0x2   :  { %v436_v3 = vpack.c.bf16 %v31_v1, %v30_v0  ;;  %v33_v4 = vld [vmem:[%s757_s1 + $0x18] sm:$0xff]  ;;  %v14_v5 = vld [vmem:[%s758_s0] sm:$0xff]  ;;  %v15_v8 = vld [vmem:[%s758_s0 + $0x8] sm:$0xff] }
   0x3   :  { %v22_v6 = vld [vmem:[%s758_s0 + $0x40] sm:$0xff]  ;;  %v440_v7 = vpack.c.bf16 %v33_v4, %v32_v2  ;;  %412 = vmatprep.mubr.msk.f32.mxu0 %vm41_vm0, %v14_v5  ;;  %v23_v9 = vld [vmem:[%s758_s0 + $0x48] sm:$0xff]  ;;  %v16_v10 = vld [vmem:[%s758_s0 + $0x10] sm:$0xff] }
   0x4   :  { %424 = vmatprep.mubr.msk.f32.mxu1 %vm41_vm0, %v22_v6  ;;  %437 = vmatprep.subr.bf16.mxu0 %v436_v3  ;;  %v24_v11 = vld [vmem:[%s758_s0 + $0x50] sm:$0xff]  ;;  %v17_v12 = vld [vmem:[%s758_s0 + $0x18] sm:$0xff]  ;;  %v18_v14 = vld [vmem:[%s758_s0 + $0x20] sm:$0xff] }
   0x5   :  { %444 = vmatprep.subr.bf16.mxu1 %v436_v3  ;;  %439 = vmatpush3.bf16.msra.mxu0 %v436_v3  ;;  %v25_v13 = vld [vmem:[%s758_s0 + $0x58] sm:$0xff]  ;;  %v26_v15 = vld [vmem:[%s758_s0 + $0x60] sm:$0xff]  ;;  %v19_v16 = vld [vmem:[%s758_s0 + $0x28] sm:$0xff] }
   0x6   :  { %446 = vmatpush3.bf16.msra.mxu1 %v436_v3  ;;  %441 = vmatprep.subr.bf16.mxu0 %v440_v7  ;;  %v27_v17 = vld [vmem:[%s758_s0 + $0x68] sm:$0xff]  ;;  %v20_v18 = vld [vmem:[%s758_s0 + $0x30] sm:$0xff]  ;;  %v21_v20 = vld [vmem:[%s758_s0 + $0x38] sm:$0xff] }
   0x7   :  { %445 = vmatprep.subr.bf16.mxu1 %v440_v7  ;;  %v28_v19 = vld [vmem:[%s758_s0 + $0x70] sm:$0xff]  ;;  %v29_v21 = vld [vmem:[%s758_s0 + $0x78] sm:$0xff]  ;;  %v579_v22 = vld [vmem:[%s759_s2] ss:$0 sm:$0xff] }
   0x9   :  { %443 = vmatpush3.bf16.msra.mxu0 %v440_v7 }
   0xa   :  { %447 = vmatpush3.bf16.msra.mxu1 %v440_v7 }
   0xc   :  { %413 = vmatmul.mubr.msk.f32.vlgmr.msra.gmra.mrb[0].mxu0 %vm41_vm0, %v15_v8 }
   0xd   :  { %425 = vmatmul.mubr.msk.f32.vlgmr.msra.gmra.mrb[0].mxu1 %vm41_vm0, %v23_v9  ;;  %415 = vmatprep.mubr.msk.f32.mxu0 %vm41_vm0, %v16_v10 }
   0xe   :  { %427 = vmatprep.mubr.msk.f32.mxu1 %vm41_vm0, %v24_v11 }
  0x10   :  { %416 = vmatmul.mubr.msk.f32.gmra.mrb[2].mxu0 %vm41_vm0, %v17_v12 }
  0x11   :  { %428 = vmatmul.mubr.msk.f32.gmra.mrb[2].mxu1 %vm41_vm0, %v25_v13  ;;  %418 = vmatprep.mubr.msk.f32.mxu0 %vm41_vm0, %v18_v14 }
  0x12   :  { %430 = vmatprep.mubr.msk.f32.mxu1 %vm41_vm0, %v26_v15 }
  0x14   :  { %419 = vmatmul.mubr.msk.f32.gmra.mrb[4].mxu0 %vm41_vm0, %v19_v16 }
  0x15   :  { %431 = vmatmul.mubr.msk.f32.gmra.mrb[4].mxu1 %vm41_vm0, %v27_v17  ;;  %421 = vmatprep.mubr.msk.f32.mxu0 %vm41_vm0, %v20_v18 }
  0x16   :  { %433 = vmatprep.mubr.msk.f32.mxu1 %vm41_vm0, %v28_v19 }
  0x18   :  { %422 = vmatmul.mubr.msk.f32.gmra.mrb[6].mxu0 %vm41_vm0, %v21_v20 }
  0x19   :  { %434 = vmatmul.mubr.msk.f32.gmra.mrb[6].mxu1 %vm41_vm0, %v29_v21 }
  0xdf   :  { %v414_v23 = vpop.f32.mrb[0].mxu0 }
  0xe0   :  { %v426_v24 = vpop.f32.mrb[0].mxu1  ;;  %v582_v25 = vadd.f32 %v414_v23, %v579_v22  ;;  %v156_v27 = vpop.f32.mrb[1].mxu0 }
  0xe1   :  { %v585_v26 = vadd.f32 %v426_v24, %v579_v22  ;;  %v196_v28 = vpop.f32.mrb[1].mxu1  ;;  %v588_v29 = vadd.f32 %v579_v22, %v156_v27 }
  0xe2   :  { %v236_v31 = vmul.f32 %v582_v25, %v582_v25  ;;  %v595_v32 = vadd.f32 %v579_v22, %v196_v28 }
  0xe3   :  { %v244_v30 = vmul.f32 %v585_v26, %v585_v26  ;;  %v417_v33 = vpop.f32.mrb[2].mxu0  ;;  %v235_v35 = vmul.f32 %v588_v29, %v588_v29 }
  0xe4   :  { %v429_v34 = vpop.f32.mrb[2].mxu1  ;;  %v600_v36 = vadd.f32 %v417_v33, %v579_v22  ;;  %v166_v37 = vpop.f32.mrb[3].mxu0  ;;  %v254_v39 = vsel %vm41_vm0, %v236_v31, 0.0  ;;  %v243_v45 = vmul.f32 %v595_v32, %v595_v32 }
  0xe5   :  { %v278_v38 = vsel %vm41_vm0, %v244_v30, 0.0  ;;  %v605_v40 = vadd.f32 %v429_v34, %v579_v22  ;;  %v206_v41 = vpop.f32.mrb[3].mxu1  ;;  %255 = vadd.xlane.f32.xlu0 %v254_v39  ;;  %v614_v47 = vadd.f32 %v579_v22, %v166_v37  ;;  %v251_v50 = vsel %vm41_vm0, %v235_v35, 0.0 }
  0xe6   :  { %279 = vadd.xlane.f32.xlu1 %v278_v38  ;;  %v238_v42 = vmul.f32 %v600_v36, %v600_v36  ;;  %v617_v48 = vadd.f32 %v579_v22, %v206_v41  ;;  %v275_v58 = vsel %vm41_vm0, %v243_v45, 0.0 }
  0xe7   :  { %v246_v43 = vmul.f32 %v605_v40, %v605_v40  ;;  %v420_v44 = vpop.f32.mrb[4].mxu0  ;;  %v237_v59 = vmul.f32 %v614_v47, %v614_v47 }
  0xe8   :  { %v432_v46 = vpop.f32.mrb[4].mxu1  ;;  %v260_v49 = vsel %vm41_vm0, %v238_v42, 0.0  ;;  %v176_v51 = vpop.f32.mrb[5].mxu0  ;;  %v623_v54 = vadd.f32 %v420_v44, %v579_v22  ;;  %v245_v60 = vmul.f32 %v617_v48, %v617_v48 }
  0xe9   :  { %v216_v52 = vpop.f32.mrb[5].mxu1  ;;  %252 = vadd.xlane.f32.xlu0 %v251_v50  ;;  %v284_v53 = vsel %vm41_vm0, %v246_v43, 0.0  ;;  %v626_v55 = vadd.f32 %v579_v22, %v176_v51  ;;  %v634_v63 = vadd.f32 %v432_v46, %v579_v22  ;;  %v257_v3 = vsel %vm41_vm0, %v237_v59, 0.0 }
  0xea   :  { %261 = vadd.xlane.f32.xlu1 %v260_v49  ;;  %v637_v0 = vadd.f32 %v579_v22, %v216_v52  ;;  %v240_v1 = vmul.f32 %v623_v54, %v623_v54  ;;  %v281_v4 = vsel %vm41_vm0, %v245_v60, 0.0 }
  0xeb   :  { %v423_v56 = vpop.f32.mrb[6].mxu0  ;;  %v239_v2 = vmul.f32 %v626_v55, %v626_v55  ;;  %v248_v5 = vmul.f32 %v634_v63, %v634_v63 }
  0xec   :  { %v435_v57 = vpop.f32.mrb[6].mxu1  ;;  %v186_v61 = vpop.f32.mrb[7].mxu0  ;;  %v247_v6 = vmul.f32 %v637_v0, %v637_v0  ;;  %v650_v7 = vadd.f32 %v423_v56, %v579_v22  ;;  %v266_v8 = vsel %vm41_vm0, %v240_v1, 0.0 }
  0xed   :  { %v226_v62 = vpop.f32.mrb[7].mxu1  ;;  %276 = vadd.xlane.f32.xlu0 %v275_v58  ;;  %v263_v9 = vsel %vm41_vm0, %v239_v2, 0.0  ;;  %v655_v10 = vadd.f32 %v579_v22, %v186_v61  ;;  %v658_v11 = vadd.f32 %v435_v57, %v579_v22  ;;  %v290_v12 = vsel %vm41_vm0, %v248_v5, 0.0 }
  0xee   :  { %285 = vadd.xlane.f32.xlu1 %v284_v53  ;;  %v287_v13 = vsel %vm41_vm0, %v247_v6, 0.0  ;;  %v663_v14 = vadd.f32 %v579_v22, %v226_v62  ;;  %v242_v15 = vmul.f32 %v650_v7, %v650_v7 }
  0xef   :  { %v241_v16 = vmul.f32 %v655_v10, %v655_v10  ;;  %v250_v19 = vmul.f32 %v658_v11, %v658_v11 }
  0xf0   :  { %v272_v17 = vsel %vm41_vm0, %v242_v15, 0.0  ;;  %v249_v20 = vmul.f32 %v663_v14, %v663_v14 }
  0xf1   :  { %282 = vadd.xlane.f32.xlu0 %v281_v4  ;;  %v269_v18 = vsel %vm41_vm0, %v241_v16, 0.0  ;;  %v296_v21 = vsel %vm41_vm0, %v250_v19, 0.0 }
  0xf2   :  { %258 = vadd.xlane.f32.xlu1 %v257_v3  ;;  %v293_v22 = vsel %vm41_vm0, %v249_v20, 0.0 }
  0xf5   :  { %264 = vadd.xlane.f32.xlu0 %v263_v9 }
  0xf6   :  { %267 = vadd.xlane.f32.xlu1 %v266_v8 }
  0xf9   :  { %288 = vadd.xlane.f32.xlu0 %v287_v13 }
  0xfa   :  { %291 = vadd.xlane.f32.xlu1 %v290_v12 }
  0xfd   :  { %270 = vadd.xlane.f32.xlu0 %v269_v18 }
  0xfe   :  { %273 = vadd.xlane.f32.xlu1 %v272_v17 }
 0x101   :  { %294 = vadd.xlane.f32.xlu0 %v293_v22 }
 0x102   :  { %297 = vadd.xlane.f32.xlu1 %v296_v21 }
 0x172   :  { %v256_v24 = vpop.xlane.xlu0 %255 }
 0x173   :  { %v280_v23 = vpop.xlane.xlu1 %279  ;;  %v300_v28 = vmax.f32 %v256_v24, 1e-24 }
 0x174   :  { %v308_v27 = vmax.f32 %v280_v23, 1e-24 }
 0x176   :  { %448 = vrsqrt.f32 %v308_v27  ;;  %v253_v31 = vpop.xlane.xlu0 %252 }
 0x177   :  { %450 = vrsqrt.f32 %v300_v28  ;;  %v262_v30 = vpop.xlane.xlu1 %261  ;;  %v299_v34 = vmax.f32 %v253_v31, 1e-24 }
 0x178   :  { %v302_v33 = vmax.f32 %v262_v30, 1e-24 }
 0x17a   :  { %452 = vrsqrt.f32 %v302_v33  ;;  %v277_v37 = vpop.xlane.xlu0 %276 }
 0x17b   :  { %454 = vrsqrt.f32 %v299_v34  ;;  %v286_v35 = vpop.xlane.xlu1 %285  ;;  %v307_v39 = vmax.f32 %v277_v37, 1e-24 }
 0x17c   :  { %v310_v38 = vmax.f32 %v286_v35, 1e-24 }
 0x17e   :  { %456 = vrsqrt.f32 %v310_v38  ;;  %v283_v42 = vpop.xlane.xlu0 %282 }
 0x17f   :  { %458 = vrsqrt.f32 %v307_v39  ;;  %v259_v41 = vpop.xlane.xlu1 %258  ;;  %v309_v45 = vmax.f32 %v283_v42, 1e-24 }
 0x180   :  { %v449_v43 = vpop.eup %448  ;;  %v301_v44 = vmax.f32 %v259_v41, 1e-24 }
 0x181   :  { %v451_v46 = vpop.eup %450  ;;  %v340_v49 = vmul.f32 %v449_v43, %v585_v26 }
 0x182   :  { %v332_v50 = vmul.f32 %v451_v46, %v582_v25  ;;  %460 = vrsqrt.f32 %v301_v44  ;;  %v265_v52 = vpop.xlane.xlu0 %264 }
 0x183   :  { %356 = vst.msk [vmem:[%s760_s3 + $0x48] sm:$0xff] %vm41_vm0, %v340_v49  ;;  %462 = vrsqrt.f32 %v309_v45  ;;  %v268_v51 = vpop.xlane.xlu1 %267  ;;  %v303_v57 = vmax.f32 %v265_v52, 1e-24 }
 0x184   :  { %v453_v53 = vpop.eup %452  ;;  %348 = vst.msk [vmem:[%s760_s3 + $0x8] sm:$0xff] %vm41_vm0, %v332_v50  ;;  %v304_v56 = vmax.f32 %v268_v51, 1e-24 }
 0x185   :  { %v455_v26 = vpop.eup %454  ;;  %v334_v25 = vmul.f32 %v453_v53, %v600_v36 }
 0x186   :  { %v331_v58 = vmul.f32 %v455_v26, %v588_v29  ;;  %464 = vrsqrt.f32 %v304_v56  ;;  %v289_v60 = vpop.xlane.xlu0 %288 }
 0x187   :  { %350 = vst.msk [vmem:[%s760_s3 + $0x18] sm:$0xff] %vm41_vm0, %v334_v25  ;;  %466 = vrsqrt.f32 %v303_v57  ;;  %v292_v59 = vpop.xlane.xlu1 %291  ;;  %v311_v1 = vmax.f32 %v289_v60, 1e-24 }
 0x188   :  { %v457_v61 = vpop.eup %456  ;;  %347 = vst.msk [vmem:[%s760_s3] sm:$0xff] %vm41_vm0, %v331_v58  ;;  %v312_v62 = vmax.f32 %v292_v59, 1e-24 }
 0x189   :  { %v459_v36 = vpop.eup %458  ;;  %v342_v29 = vmul.f32 %v457_v61, %v605_v40 }
 0x18a   :  { %v339_v2 = vmul.f32 %v459_v36, %v595_v32  ;;  %468 = vrsqrt.f32 %v312_v62  ;;  %v271_v4 = vpop.xlane.xlu0 %270 }
 0x18b   :  { %358 = vst.msk [vmem:[%s760_s3 + $0x58] sm:$0xff] %vm41_vm0, %v342_v29  ;;  %470 = vrsqrt.f32 %v311_v1  ;;  %v274_v3 = vpop.xlane.xlu1 %273  ;;  %v305_v8 = vmax.f32 %v271_v4, 1e-24 }
 0x18c   :  { %v461_v5 = vpop.eup %460  ;;  %355 = vst.msk [vmem:[%s760_s3 + $0x40] sm:$0xff] %vm41_vm0, %v339_v2  ;;  %v306_v6 = vmax.f32 %v274_v3, 1e-24 }
 0x18d   :  { %v463_v40 = vpop.eup %462  ;;  %v333_v32 = vmul.f32 %v461_v5, %v614_v47 }
 0x18e   :  { %v341_v9 = vmul.f32 %v463_v40, %v617_v48  ;;  %472 = vrsqrt.f32 %v306_v6  ;;  %v295_v13 = vpop.xlane.xlu0 %294 }
 0x18f   :  { %349 = vst.msk [vmem:[%s760_s3 + $0x10] sm:$0xff] %vm41_vm0, %v333_v32  ;;  %474 = vrsqrt.f32 %v305_v8  ;;  %v298_v12 = vpop.xlane.xlu1 %297  ;;  %v313_v17 = vmax.f32 %v295_v13, 1e-24 }
 0x190   :  { %v465_v15 = vpop.eup %464  ;;  %357 = vst.msk [vmem:[%s760_s3 + $0x50] sm:$0xff] %vm41_vm0, %v341_v9  ;;  %v314_v16 = vmax.f32 %v298_v12, 1e-24 }
 0x191   :  { %v467_v47 = vpop.eup %466  ;;  %v336_v48 = vmul.f32 %v465_v15, %v623_v54 }
 0x192   :  { %v335_v18 = vmul.f32 %v467_v47, %v626_v55  ;;  %476 = vrsqrt.f32 %v314_v16 }
 0x193   :  { %352 = vst.msk [vmem:[%s760_s3 + $0x28] sm:$0xff] %vm41_vm0, %v336_v48  ;;  %478 = vrsqrt.f32 %v313_v17 }
 0x194   :  { %v469_v19 = vpop.eup %468  ;;  %351 = vst.msk [vmem:[%s760_s3 + $0x20] sm:$0xff] %vm41_vm0, %v335_v18 }
 0x195   :  { %v471_v20 = vpop.eup %470  ;;  %v344_v21 = vmul.f32 %v469_v19, %v634_v63 }
 0x196   :  { %v343_v54 = vmul.f32 %v471_v20, %v637_v0 }
 0x197   :  { %360 = vst.msk [vmem:[%s760_s3 + $0x68] sm:$0xff] %vm41_vm0, %v344_v21 }
 0x198   :  { %v473_v55 = vpop.eup %472  ;;  %359 = vst.msk [vmem:[%s760_s3 + $0x60] sm:$0xff] %vm41_vm0, %v343_v54 }
 0x199   :  { %v475_v22 = vpop.eup %474  ;;  %v338_v23 = vmul.f32 %v473_v55, %v650_v7 }
 0x19a   :  { %v337_v24 = vmul.f32 %v475_v22, %v655_v10 }
 0x19b   :  { %354 = vst.msk [vmem:[%s760_s3 + $0x38] sm:$0xff] %vm41_vm0, %v338_v23 }
 0x19c   :  { %v477_v63 = vpop.eup %476  ;;  %353 = vst.msk [vmem:[%s760_s3 + $0x30] sm:$0xff] %vm41_vm0, %v337_v24 }
 0x19d   :  { %v479_v0 = vpop.eup %478  ;;  %v346_v27 = vmul.f32 %v477_v63, %v658_v11 }
 0x19e   :  { %v345_v28 = vmul.f32 %v479_v0, %v663_v14 }
 0x19f   :  { %362 = vst.msk [vmem:[%s760_s3 + $0x78] sm:$0xff] %vm41_vm0, %v346_v27 }
 0x1a0   :  { %361 = vst.msk [vmem:[%s760_s3 + $0x70] sm:$0xff] %vm41_vm0, %v345_v28 }

// kernel: brownian_bridge_criterion.3
= control target key start
LH: loop header
LB: loop body
LE: loop exit
PB: predicated region body
PF: predicated region fallthrough
CT: control target
= control target key end

     0   :  { %s1116_s15 = smov 0   ;;  %s1320_s0 = inlined_call_operand.vmem [shape: s32[16,1], index: 0, kind: input, shape index: {}]   ;;  %s1321_s1 = inlined_call_operand.vmem [shape: f32[8,16,32], index: 1, kind: input, shape index: {}, may-alias: {1,2,3}]   ;;  %s1322_s2 = inlined_call_operand.vmem [shape: f32[8,16,32], index: 2, kind: input, shape index: {}, may-alias: {1,2,3}]   ;;  %s1323_s3 = inlined_call_operand.vmem [shape: f32[8,16,32], index: 3, kind: input, shape index: {}, may-alias: {1,2,3}]   ;;  %s1324_s4 = inlined_call_operand.vmem [shape: f32[16,128], index: 4, kind: output, shape index: {}]  }
   0x1 LB: > { %s937_s16 = sadd.s32 4294967295, %s1085_s15   ;;  %p941_p0 = scmp.ge.s32.totalorder %s1085_s15, 1  ;;  %s1085_s15 = sphi %s1116_s15, %s14_s15  }
   0x2   : > { %p180_p1 = scmp.lt.s32.totalorder %s1085_s15, 3 }
   0x4   : > { %p181_p2 = pnand %p941_p0, %p180_p1 }
   0x5   : > { %vm255_vm0 = vcmask (!%p181_p2), 261120   ;;  %v1127_v0 = vld [vmem:[%s1323_s3 + $0x20] sm:$0xff] (!%p181_p2)  ;;  %v1132_v1 = vld [vmem:[%s1323_s3 + $0x10] sm:$0xff] (!%p181_p2)  ;;  %v1137_v2 = vld [vmem:[%s1323_s3 + $0x28] sm:$0xff] (!%p181_p2)  ;;  %p213_p3 = scmp.lt.s32.totalorder (!%p181_p2), %s937_s16, 1  ;;  %v1087_v7 = vmov (!%p181_p2), 0  }
   0x6   : > { %184 = sbr.rel (%p181_p2) target bundleno = 455 (0x1c7), region = 36  ;;  %v365_v3 = vmul.f32 (!%p181_p2), %v1127_v0, %v1127_v0  ;;  %v264_v4 = vmul.f32 (!%p181_p2), %v1132_v1, %v1132_v1  ;;  %v366_v5 = vmul.f32 (!%p181_p2), %v1137_v2, %v1137_v2  ;;  %v1148_v6 = vld [vmem:[%s1323_s3 + $0x18] sm:$0xff] (!%p181_p2)  ;;  %1076 = vset.pattern.permute.xlu1 (!%p181_p2), %v1087_v7  ;;  %1075 = vset.pattern.permute.xlu0 (!%p181_p2), %v1087_v7  ;;  %v1162_v10 = vld [vmem:[%s1323_s3 + $0x30] sm:$0xff] (!%p181_p2)  ;;  %v1181_v17 = vld [vmem:[%s1323_s3 + $0x48] sm:$0xff] (!%p181_p2)  ;;  %v1088_v29 = vmov (!%p181_p2), 0.0|0.0  }
   0x7   : > { %v265_v8 = vmul.f32 (!%p181_p2), %v1148_v6, %v1148_v6  ;;  %v1157_v9 = vld [vmem:[%s1323_s3 + $0x38] sm:$0xff] (!%p181_p2)  ;;  %v462_v16 = vmul.f32 (!%p181_p2), %v1162_v10, %v1162_v10  ;;  %v1186_v18 = vld [vmem:[%s1323_s3 + $0x40] sm:$0xff] (!%p181_p2)  ;;  %v560_v22 = vmul.f32 (!%p181_p2), %v1181_v17, %v1181_v17  ;;  %1043 = vmatprep.subr.bf16.mxu1 (!%p181_p2), %v1088_v29  ;;  %1039 = vmatprep.subr.bf16.mxu0 (!%p181_p2), %v1088_v29  ;;  %vm1089_vm4 = vmmov (!%p181_p2), 0   ;;  %v1211_v35 = vld [vmem:[%s1323_s3 + $0x50] sm:$0xff] (!%p181_p2) }
   0x8   : > { %v367_v11 = vsel (!%p181_p2), %vm255_vm0, %v365_v3, 0.0  ;;  %v266_v12 = vsel (!%p181_p2), %vm255_vm0, %v264_v4, 0.0  ;;  %v370_v13 = vsel (!%p181_p2), %vm255_vm0, %v366_v5, 0.0  ;;  %v463_v15 = vmul.f32 (!%p181_p2), %v1157_v9, %v1157_v9  ;;  %v1216_v36 = vld [vmem:[%s1323_s3 + $0x58] sm:$0xff] (!%p181_p2)  ;;  %v1225_v39 = vld [vmem:[%s1323_s3 + $0x60] sm:$0xff] (!%p181_p2)  ;;  %v1234_v44 = vld [vmem:[%s1323_s3 + $0x68] sm:$0xff] (!%p181_p2) }
   0x9   : > { %368 = vadd.xlane.f32.xlu1 (!%p181_p2), %v367_v11  ;;  %267 = vadd.xlane.f32.xlu0 (!%p181_p2), %v266_v12  ;;  %v269_v14 = vsel (!%p181_p2), %vm255_vm0, %v265_v8, 0.0  ;;  %v464_v21 = vsel (!%p181_p2), %vm255_vm0, %v462_v16, 0.0  ;;  %v559_v23 = vmul.f32 (!%p181_p2), %v1186_v18, %v1186_v18  ;;  %v564_v27 = vsel (!%p181_p2), %vm255_vm0, %v560_v22, 0.0 }
   0xa   : > { %v467_v20 = vsel (!%p181_p2), %vm255_vm0, %v463_v15, 0.0  ;;  %v1090_v33 = vmov (!%p181_p2), 0.0   ;;  %v656_v37 = vmul.f32 (!%p181_p2), %v1211_v35, %v1211_v35  ;;  %v657_v38 = vmul.f32 (!%p181_p2), %v1216_v36, %v1216_v36 }
   0xb   : > { %v561_v28 = vsel (!%p181_p2), %vm255_vm0, %v559_v23, 0.0  ;;  %1001 = vmatprep.mubr.msk.f32.mxu0 (!%p181_p2), %vm1089_vm4, %v1090_v33  ;;  %1008 = vmatprep.mubr.msk.f32.mxu1 (!%p181_p2), %vm1089_vm4, %v1090_v33  ;;  %v753_v43 = vmul.f32 (!%p181_p2), %v1225_v39, %v1225_v39  ;;  %v754_v47 = vmul.f32 (!%p181_p2), %v1234_v44, %v1234_v44  ;;  %vm274_vm8 = vcmask (!%p181_p2), 269312  }
   0xc   : > { %v658_v41 = vsel (!%p181_p2), %vm255_vm0, %v656_v37, 0.0  ;;  %v661_v42 = vsel (!%p181_p2), %vm255_vm0, %v657_v38, 0.0  ;;  %vm1252_vm9 = vmpackc.low (!%p181_p2), %vm274_vm8, %vm274_vm8 }
   0xd   : > { %s1328_s16 = smov (!%p213_p3, %s937_s16), 1  ;;  %371 = vadd.xlane.f32.xlu1 %v370_v13  ;;  %270 = vadd.xlane.f32.xlu0 %v269_v14  ;;  %v755_v46 = vsel %vm255_vm0, %v753_v43, 0.0  ;;  %v758_v49 = vsel %vm255_vm0, %v754_v47, 0.0 }
   0xe   : > { %s1166_s29 = sshll.u32 %s1328_s16, 3 }
   0xf   : > { %s216_s6 = scalar_lea.vmem %s1320_s0, %s1166_s29  ;;  %s897_s22 = scalar_lea.vmem %s1322_s2, %s1166_s29 }
  0x10   : > { %v230_v19 = vld [vmem:[%s216_s6] sm:$0xff]  ;;  %s220_s25 = scalar_lea.vmem %s1321_s1, %s1166_s29  ;;  %v946_v5 = vld [vmem:[%s897_s22 + $0x70] sm:$0xff]  ;;  %s229_s28 = scalar_lea.vmem %s1324_s4, %s1166_s29 }
  0x11   : > { %vm548_vm1 = vcmp.eq.s32.totalorder %v230_v19, 3  ;;  %vm645_vm2 = vcmp.eq.s32.totalorder %v230_v19, 4  ;;  %vm742_vm3 = vcmp.eq.s32.totalorder %v230_v19, 5  ;;  %468 = vadd.xlane.f32.xlu1 %v467_v20  ;;  %465 = vadd.xlane.f32.xlu0 %v464_v21  ;;  %v231_v30 = vcvt.s32.f32 %v230_v19 }
  0x12   : > { %v550_v24 = vsel %vm548_vm1, 1, %v1087_v7  ;;  %v647_v25 = vsel %vm645_vm2, 1, %v1087_v7  ;;  %v744_v26 = vsel %vm742_vm3, 1, %v1087_v7  ;;  %vm839_vm5 = vcmp.eq.s32.totalorder %v230_v19, 6 }
  0x13   : > { %v232_v31 = vmul.f32 0.14285715, %v231_v30  ;;  %v1206_v34 = vsel %vm839_vm5, 1, %v1087_v7  ;;  %v233_v40 = vsub.f32 7.0, %v231_v30  ;;  %vm451_vm6 = vcmp.eq.s32.totalorder %v230_v19, 2 }
  0x14   : > { %v453_v51 = vsel %vm451_vm6, 1, %v1087_v7  ;;  %vm354_vm7 = vcmp.eq.s32.totalorder %v230_v19, 1 }
  0x15   : > { %565 = vadd.xlane.f32.xlu1 %v564_v27  ;;  %562 = vadd.xlane.f32.xlu0 %v561_v28  ;;  %v240_v32 = vsub.f32 1.0, %v232_v31  ;;  %v234_v45 = vmul.f32 %v233_v40, %v232_v31  ;;  %v356_v52 = vsel %vm354_vm7, 1, %v1087_v7  ;;  %v238_v7 = vld [vmem:[%s220_s25] sm:$0xff] }
  0x17   : > { %v235_v48 = vmul.f32 2.0, %v234_v45 }
  0x19   : > { %v236_v50 = vmul.f32 %v235_v48, %v234_v45 }
  0x1b   : > { %1077 = vrcp.f32 %v236_v50 }
  0x25   : > { %v1078_v53 = vpop.eup %1077 }
  0x26   : > { %249 = vperm.xlu1 %1076, %v232_v31  }
  0x2b   : > { %243 = vperm.xlu0 %1075, %v240_v32  }
  0x4a   : > { %659 = vadd.xlane.f32.xlu1 %v658_v41  ;;  %662 = vadd.xlane.f32.xlu0 %v661_v42 }
  0x4e   : > { %756 = vadd.xlane.f32.xlu1 %v755_v46 }
  0x52   : > { %759 = vadd.xlane.f32.xlu1 %v758_v49 }
  0x60   : > { %455 = vperm.xlu0 %1075, %v453_v51  }
  0x63   : > { %358 = vperm.xlu1 %1076, %v356_v52  }
  0x64   : > { %850 = vperm.xlu0 %1075, %v1078_v53  }
  0x67   : > { %552 = vperm.xlu1 %1076, %v550_v24  }
  0x6b   : > { %649 = vperm.xlu1 %1076, %v647_v25  }
  0x6f   : > { %746 = vperm.xlu1 %1076, %v744_v26  }
  0x96   : > { %v369_v54 = vpop.xlane.xlu1 %368  ;;  %v268_v55 = vpop.xlane.xlu0 %267 }
  0x97   : > { %v272_v56 = vsel %vm255_vm0, %v1132_v1, %v268_v55  ;;  %v373_v59 = vsel %vm255_vm0, %v1127_v0, %v369_v54 }
  0x9a   : > { %v372_v57 = vpop.xlane.xlu1 %371  ;;  %v271_v58 = vpop.xlane.xlu0 %270 }
  0x9b   : > { %v374_v60 = vsel %vm255_vm0, %v1137_v2, %v372_v57  ;;  %v273_v61 = vsel %vm255_vm0, %v1148_v6, %v271_v58 }
  0x9c   : > { %v1044_v63 = vpack.c.bf16 %v374_v60, %v373_v59  ;;  %v1040_v1 = vpack.c.bf16 %v273_v61, %v272_v56 }
  0x9e   : > { %1046 = vmatpush3.bf16.xpose.msk.msra.mxu1 %vm1252_vm9, %v1044_v63  ;;  %v469_v3 = vpop.xlane.xlu1 %468  ;;  %1042 = vmatpush3.bf16.xpose.msk.msra.mxu0 %vm1252_vm9, %v1040_v1  ;;  %v466_v0 = vpop.xlane.xlu0 %465 }
  0x9f   : > { %1047 = vmatprep.subr.bf16.mxu0 %v1088_v29  ;;  %1051 = vmatprep.subr.bf16.mxu1 %v1088_v29  ;;  %v471_v14 = vsel %vm255_vm0, %v1157_v9, %v469_v3  ;;  %v470_v15 = vsel %vm255_vm0, %v1162_v10, %v466_v0 }
  0xa0   : > { %v1048_v22 = vpack.c.bf16 %v471_v14, %v470_v15 }
  0xa2   : > { %v566_v2 = vpop.xlane.xlu1 %565  ;;  %v563_v4 = vpop.xlane.xlu0 %562 }
  0xa3   : > { %v568_v16 = vsel %vm255_vm0, %v1181_v17, %v566_v2  ;;  %v567_v19 = vsel %vm255_vm0, %v1186_v18, %v563_v4 }
  0xa4   : > { %v1052_v23 = vpack.c.bf16 %v568_v16, %v567_v19 }
  0xa6   : > { %v250_v6 = vpop.permute.xlu1 %249 }
  0xa7   : > { %v252_v11 = vmul.f32 %v946_v5, %v250_v6 }
  0xaa   : > { %v244_v8 = vpop.permute.xlu0 %243 }
  0xab   : > { %v246_v12 = vmul.f32 %v244_v8, %v238_v7 }
  0xad   : > { %v253_v13 = vadd.f32 %v252_v11, %v246_v12 }
  0xaf   : > { %v259_v20 = vmul.f32 -2.0, %v253_v13  ;;  %v254_v21 = vmul.f32 %v253_v13, %v253_v13 }
  0xb1   : > { %v260_v24 = vsel %vm255_vm0, %v259_v20, 1.0  ;;  %v256_v25 = vsel %vm255_vm0, %v254_v21, 0.0 }
  0xb2   : > { %1002 = vmatmul.mubr.msk.f32.vlgmr.msra.gmra.mrb[0].mxu0 %vm274_vm8, %v260_v24  ;;  %1009 = vmatmul.mubr.msk.f32.vlgmr.msra.gmra.mrb[0].mxu1 %vm274_vm8, %v260_v24 }
  0xb3   : > { %1050 = vmatpush3.bf16.xpose.msk.msra.mxu0 %vm1252_vm9, %v1048_v22  ;;  %1054 = vmatpush3.bf16.xpose.msk.msra.mxu1 %vm1252_vm9, %v1052_v23 }
  0xb4   : > { %257 = vadd.xlane.f32.xlu1 %v256_v25  ;;  %1015 = vmatprep.mubr.msk.f32.mxu0 %vm1089_vm4, %v1090_v33 }
  0xb5   : > { %1022 = vmatprep.mubr.msk.f32.mxu1 %vm1089_vm4, %v1090_v33  ;;  %1055 = vmatprep.subr.bf16.mxu0 %v1088_v29 }
  0xb6   : > { %1059 = vmatprep.subr.bf16.mxu1 %v1088_v29 }
  0xba   : > { %1016 = vmatmul.mubr.msk.f32.vlgmr.msra.gmra.mrb[2].mxu0 %vm274_vm8, %v260_v24  ;;  %1023 = vmatmul.mubr.msk.f32.vlgmr.msra.gmra.mrb[2].mxu1 %vm274_vm8, %v260_v24 }
  0xbb   : > { %1029 = vmatprep.mubr.msk.f32.mxu0 %vm1089_vm4, %v1090_v33  ;;  %1036 = vmatprep.mubr.msk.f32.mxu1 %vm1089_vm4, %v1090_v33 }
  0xc5   : > { %843 = vperm.xlu1 %1076, %v1206_v34  }
  0xd7   : > { %v660_v9 = vpop.xlane.xlu1 %659  ;;  %v663_v10 = vpop.xlane.xlu0 %662 }
  0xd8   : > { %v664_v17 = vsel %vm255_vm0, %v1211_v35, %v660_v9  ;;  %v665_v18 = vsel %vm255_vm0, %v1216_v36, %v663_v10 }
  0xd9   : > { %v1056_v26 = vpack.c.bf16 %v665_v18, %v664_v17 }
  0xdb   : > { %v757_v27 = vpop.xlane.xlu1 %756  ;;  %1058 = vmatpush3.bf16.xpose.msk.msra.mxu0 %vm1252_vm9, %v1056_v26 }
  0xdc   : > { %v761_v29 = vsel %vm255_vm0, %v1225_v39, %v757_v27 }
  0xdf   : > { %v760_v28 = vpop.xlane.xlu1 %759  ;;  %v456_v36 = vpop.permute.xlu0 %455 }
  0xe0   : > { %v762_v30 = vsel %vm255_vm0, %v1234_v44, %v760_v28  ;;  %vm457_vm11 = vcmp.eq.s32.totalorder %v456_v36, 1  ;;  %vm854_vm0 = vcmask 130048  }
  0xe1   : > { %v1060_v31 = vpack.c.bf16 %v762_v30, %v761_v29 }
  0xe2   : > { %1030 = vmatmul.mubr.msk.f32.vlgmr.msra.gmra.mrb[4].mxu0 %vm274_vm8, %v260_v24 }
  0xe3   : > { %1062 = vmatpush3.bf16.xpose.msk.msra.mxu1 %vm1252_vm9, %v1060_v31  ;;  %v359_v32 = vpop.permute.xlu1 %358  ;;  %v851_v1 = vpop.permute.xlu0 %850 }
  0xe4   : > { %vm360_vm10 = vcmp.eq.s32.totalorder %v359_v32, 1 }
  0xe7   : > { %v553_v33 = vpop.permute.xlu1 %552 }
  0xe8   : > { %vm554_vm12 = vcmp.eq.s32.totalorder %v553_v33, 1 }
  0xea   : > { %1037 = vmatmul.mubr.msk.f32.vlgmr.msra.gmra.mrb[4].mxu1 %vm274_vm8, %v260_v24 }
  0xeb   : > { %v650_v34 = vpop.permute.xlu1 %649 }
  0xec   : > { %vm651_vm13 = vcmp.eq.s32.totalorder %v650_v34, 1 }
  0xef   : > { %v747_v35 = vpop.permute.xlu1 %746 }
  0xf0   : > { %vm748_vm14 = vcmp.eq.s32.totalorder %v747_v35, 1 }
 0x141   : > { %v258_v37 = vpop.xlane.xlu1 %257 }
 0x145   : > { %v844_v58 = vpop.permute.xlu1 %843 }
 0x146   : > { %vm845_vm15 = vcmp.eq.s32.totalorder %v844_v58, 1 }
 0x185   : > { %v350_v38 = vpop.f32.mrb[0].mxu0  ;;  %v447_v40 = vpop.f32.mrb[0].mxu1 }
 0x186   : > { %v355_v39 = vadd.f32 %v350_v38, %v258_v37  ;;  %v452_v41 = vadd.f32 %v447_v40, %v258_v37  ;;  %v1003_v42 = vpop.f32.mrb[1].mxu0  ;;  %v1010_v43 = vpop.f32.mrb[1].mxu1 }
 0x188   : > { %v361_v44 = vsel %vm360_vm10, %v355_v39, 0.0 }
 0x189   : > { %v458_v45 = vsel %vm457_vm11, %v452_v41, %v361_v44 }
 0x18d   : > { %v544_v46 = vpop.f32.mrb[2].mxu0  ;;  %v641_v47 = vpop.f32.mrb[2].mxu1 }
 0x18e   : > { %v549_v48 = vadd.f32 %v544_v46, %v258_v37  ;;  %v646_v49 = vadd.f32 %v641_v47, %v258_v37  ;;  %v1017_v50 = vpop.f32.mrb[3].mxu0  ;;  %v1024_v51 = vpop.f32.mrb[3].mxu1 }
 0x190   : > { %v555_v52 = vsel %vm554_vm12, %v549_v48, %v458_v45 }
 0x191   : > { %v652_v53 = vsel %vm651_vm13, %v646_v49, %v555_v52 }
 0x1b5   : > { %v738_v54 = vpop.f32.mrb[4].mxu0 }
 0x1b6   : > { %v743_v55 = vadd.f32 %v738_v54, %v258_v37  ;;  %v1031_v56 = vpop.f32.mrb[5].mxu0 }
 0x1b8   : > { %v749_v57 = vsel %vm748_vm14, %v743_v55, %v652_v53 }
 0x1bd   : > { %v835_v59 = vpop.f32.mrb[4].mxu1 }
 0x1be   : > { %v840_v60 = vadd.f32 %v835_v59, %v258_v37  ;;  %v1038_v61 = vpop.f32.mrb[5].mxu1 }
 0x1c0   : > { %v846_v62 = vsel %vm845_vm15, %v840_v60, %v749_v57 }
 0x1c1   : > { %v847_v63 = vsub.f32 0.0, %v846_v62 }
 0x1c3   : > { %v853_v3 = vmul.f32 %v851_v1, %v847_v63 }
 0x1c5   : > { %v855_v0 = vsel %vm854_vm0, %v853_v3, -30000.0 }
 0x1c6   : > { %856 = vst [vmem:[%s229_s28] sm:$0xff] %v855_v0 }
 0x1c7 PF: > { %s14_s15 = sadd.s32 1, %s1085_s15  }
 0x1c8   : > { %p11_p4 = scmp.ge.s32.totalorder %s14_s15, 4  }
 0x1ca   :  { %13 = sbr.rel (!%p11_p4) target bundleno = 1 (0x1), region = 78 }

</bundles_post_ra>
